<compile_context>
chip_gen: v7x
topology: tpu7x:2x2x1
jax: 0.10.0
libtpu: 0.0.40
codegen_flags: <defaults>
</compile_context>

<pallas_src>
import functools

import jax
import jax.numpy as jnp
from jax.experimental import pallas as pl
from jax.experimental.pallas import tpu as pltpu

_BN_EPS = 1e-5
_LANE = 128

_VMEM_LIMIT_BYTES = None


def _vmem_limit_bytes():
    """Per-generation VMEM limit (computed once, outside of tracing)."""
    global _VMEM_LIMIT_BYTES
    if _VMEM_LIMIT_BYTES is None:
        cap = 64 * 1024 * 1024
        try:
            cap = int(pltpu.get_tpu_info().vmem_capacity_bytes)
        except Exception:
            pass
        # ~40 MiB on v7x (64 MiB physical), up to 100 MiB on v5e/v6e (128 MiB).
        _VMEM_LIMIT_BYTES = int(min(100 * 1024 * 1024,
                                    max(32 * 1024 * 1024, cap - 24 * 1024 * 1024)))
    return _VMEM_LIMIT_BYTES


# ----------------------------------------------------------------------------
# Fused kernel: unpool + cheb-conv1 -> BatchNorm(train) + ReLU -> cheb-conv2
# ----------------------------------------------------------------------------
def _make_fused_kernel(K, n_bn):
    """K: Chebyshev order (both convs); n_bn: BN samples per channel (B*V)."""
    inv_n = 1.0 / float(n_bn)

    def _cheb_cat(lap_bf, t0_f, t0_b, t1_f):
        """Lane-concatenated bf16 Chebyshev iterates [T_0 | T_1 | ... | T_{K-1}].

        t0_f/t0_b: first iterate in f32 / bf16 (bf16 cast hoisted, reused).
        t1_f: second iterate (f32) or None when K == 1.
        Recurrence state kept in f32; MXU inputs bf16 with f32 accumulation.
        """
        cats = [t0_b]
        if K > 1:
            t1_b = t1_f.astype(jnp.bfloat16)
            cats.append(t1_b)
            tm2_f, tm1_f, tm1_b = t0_f, t1_f, t1_b
            for _ in range(2, K):
                tk_f = 2.0 * jnp.dot(lap_bf, tm1_b,
                                     preferred_element_type=jnp.float32) - tm2_f
                tk_b = tk_f.astype(jnp.bfloat16)
                cats.append(tk_b)
                tm2_f, tm1_f, tm1_b = tm1_f, tk_f, tk_b
        if len(cats) == 1:
            return cats[0]
        return jnp.concatenate(cats, axis=1)

    def kernel(x_ref, r_ref, l4_ref, lap_ref, w1_ref, b1_ref, g_ref, be_ref,
               p_ref, pt_ref, w2_ref, b2_ref, o_ref):
        lap = lap_ref[...]                                     # (V, V) bf16

        # ---- conv1 (in -> mid): Healpix unpool folded into T0 / T1 ----------
        x_b = x_ref[...].astype(jnp.bfloat16)                  # (Vin, B*Cin)
        t0_f = jnp.dot(r_ref[...], x_b,
                       preferred_element_type=jnp.float32)     # (V, B*Cin) repeat
        t0_b = t0_f.astype(jnp.bfloat16)
        t1_f = (jnp.dot(l4_ref[...], x_b, preferred_element_type=jnp.float32)
                if K > 1 else None)                            # (V, B*Cin) = L @ T0
        tcat1 = _cheb_cat(lap, t0_f, t0_b, t1_f)               # (V, K*B*Cin) bf16
        y = jnp.dot(tcat1, w1_ref[...],
                    preferred_element_type=jnp.float32) + b1_ref[...]  # (V, B*Cmid)

        # ---- BatchNorm1d (training batch stats, two-pass) + ReLU ------------
        colsum = jnp.sum(y, axis=0, keepdims=True)             # (1, B*Cmid)
        mean_c = jnp.dot(colsum, p_ref[...],
                         preferred_element_type=jnp.float32) * inv_n    # (1, Cmid)
        mean_p = jnp.dot(mean_c, pt_ref[...],
                         preferred_element_type=jnp.float32)   # (1, B*Cmid)
        yc = y - mean_p
        sqsum = jnp.sum(yc * yc, axis=0, keepdims=True)        # centered 2nd pass
        var_c = jnp.dot(sqsum, p_ref[...],
                        preferred_element_type=jnp.float32) * inv_n
        inv_c = jax.lax.rsqrt(var_c + _BN_EPS)                 # EUP slot
        inv_p = jnp.dot(inv_c, pt_ref[...], preferred_element_type=jnp.float32)
        y = jnp.maximum(yc * inv_p * g_ref[...] + be_ref[...], 0.0)

        # ---- conv2 (mid -> out) ----------------------------------------------
        y_b = y.astype(jnp.bfloat16)
        t1b_f = (jnp.dot(lap, y_b, preferred_element_type=jnp.float32)
                 if K > 1 else None)
        tcat2 = _cheb_cat(lap, y, y_b, t1b_f)                  # (V, K*B*Cmid) bf16
        out = jnp.dot(tcat2, w2_ref[...],
                      preferred_element_type=jnp.float32) + b2_ref[...]
        o_ref[...] = out.astype(o_ref.dtype)                   # lane-dense (mult of 128)

    return kernel


# ----------------------------------------------------------------------------
# Module wrapper
# ----------------------------------------------------------------------------
@functools.partial(jax.jit, static_argnames=("vmem_limit",))
def _forward_impl(x, params, vmem_limit):
    w1, b1 = params["w1"], params["b1"]
    w2, b2 = params["w2"], params["b2"]
    gamma, beta, lap = params["gamma"], params["beta"], params["lap"]

    B, Vin, Cin = x.shape
    _, K, Cmid = w1.shape
    Cout = w2.shape[2]
    V = 4 * Vin
    assert lap.shape == (V, V)
    assert w2.shape == (Cmid, K, Cout)

    Nin, Nmid, Nout = B * Cin, B * Cmid, B * Cout
    Nout_pad = max(_LANE, -(-Nout // _LANE) * _LANE)

    # Batch folded into the matmul lane/N dimension (column index b*C + c).
    xp = jnp.transpose(x, (1, 0, 2)).reshape(Vin, Nin)                   # (Vin, B*Cin)

    # Healpix unpool folded into conv1: R repeats each parent row 4x,
    # L4 pre-sums the 4 child columns of each parent (T1 = L @ repeat(x) = L4 @ x).
    rmat = jnp.repeat(jnp.eye(Vin, dtype=jnp.float32), 4, axis=0)        # (V, Vin)
    lap4 = lap.reshape(V, Vin, 4).sum(axis=-1)                           # (V, Vin)

    # Fused channel-mix weights: concatenated Chebyshev iterates (lane index
    # k*B*C + b*C + i) contracted against one (K*B*Cin, B*Cmid) block-diag matrix.
    eye_b = jnp.eye(B, dtype=jnp.float32)
    w1_cat = jnp.concatenate([jnp.kron(eye_b, w1[:, k, :]) for k in range(K)],
                             axis=0).astype(jnp.bfloat16)                # (K*Nin, Nmid)
    w2_cat = jnp.concatenate([jnp.kron(eye_b, w2[:, k, :]) for k in range(K)],
                             axis=0)                                     # (K*Nmid, Nout)
    w2_cat = jnp.pad(w2_cat, ((0, 0), (0, Nout_pad - Nout))).astype(jnp.bfloat16)

    b1_p = jnp.tile(b1, B).reshape(1, Nmid)
    b2_p = jnp.pad(jnp.tile(b2, B), (0, Nout_pad - Nout)).reshape(1, Nout_pad)
    g_p = jnp.tile(gamma, B).reshape(1, Nmid)
    be_p = jnp.tile(beta, B).reshape(1, Nmid)
    # 0/1 pooling matrices: sum the B lane groups per channel / broadcast back.
    pool = jnp.tile(jnp.eye(Cmid, dtype=jnp.float32), (B, 1))            # (Nmid, Cmid)
    pool_t = jnp.transpose(pool)                                         # (Cmid, Nmid)

    lap_bf = lap.astype(jnp.bfloat16)
    rmat_bf = rmat.astype(jnp.bfloat16)
    lap4_bf = lap4.astype(jnp.bfloat16)

    flops = (
        2 * V * Vin * Nin                                  # T0 = R @ x (unpool)
        + (2 * V * Vin * Nin if K > 1 else 0)              # T1 = L4 @ x
        + max(K - 2, 0) * 2 * V * V * Nin                  # conv1 recurrence
        + 2 * V * (K * Nin) * Nmid                         # conv1 fused channel mix
        + 10 * V * Nmid                                    # BN + ReLU
        + max(K - 1, 0) * 2 * V * V * Nmid                 # conv2 recurrence
        + 2 * V * (K * Nmid) * Nout_pad                    # conv2 fused channel mix
    )
    bytes_accessed = (
        4 * (Vin * Nin + V * Nout_pad + 4 * Nmid + Nout_pad + 2 * Nmid * Cmid)
        + 2 * (V * V + 2 * V * Vin + K * Nin * Nmid + K * Nmid * Nout_pad)
    )

    out_packed = pl.pallas_call(
        _make_fused_kernel(K, B * V),
        out_shape=jax.ShapeDtypeStruct((V, Nout_pad), x.dtype),
        in_specs=[
            pl.BlockSpec((Vin, Nin), lambda: (0, 0)),              # x (un-repeated)
            pl.BlockSpec((V, Vin), lambda: (0, 0)),                # R (unpool)
            pl.BlockSpec((V, Vin), lambda: (0, 0)),                # L4
            pl.BlockSpec((V, V), lambda: (0, 0)),                  # L
            pl.BlockSpec((K * Nin, Nmid), lambda: (0, 0)),         # w1 (fused K)
            pl.BlockSpec((1, Nmid), lambda: (0, 0)),               # b1
            pl.BlockSpec((1, Nmid), lambda: (0, 0)),               # gamma
            pl.BlockSpec((1, Nmid), lambda: (0, 0)),               # beta
            pl.BlockSpec((Nmid, Cmid), lambda: (0, 0)),            # BN pool
            pl.BlockSpec((Cmid, Nmid), lambda: (0, 0)),            # BN pool^T
            pl.BlockSpec((K * Nmid, Nout_pad), lambda: (0, 0)),    # w2 (fused K, padded)
            pl.BlockSpec((1, Nout_pad), lambda: (0, 0)),           # b2 (padded)
        ],
        out_specs=pl.BlockSpec((V, Nout_pad), lambda: (0, 0)),
        compiler_params=pltpu.CompilerParams(vmem_limit_bytes=vmem_limit),
        cost_estimate=pl.CostEstimate(flops=int(flops), transcendentals=int(Cmid),
                                      bytes_accessed=int(bytes_accessed)),
    )(xp, rmat_bf, lap4_bf, lap_bf, w1_cat, b1_p, g_p, be_p,
      pool, pool_t, w2_cat, b2_p)

    # Drop padded lanes and unpack back to [B, 4*Vin, Cout].
    out = out_packed[:, :Nout].reshape(V, B, Cout)
    return jnp.transpose(out, (1, 0, 2))


def spherical_cheb_bn_pool_cheb(x, params):
    """x: [B, Vin, Cin] -> [B, 4*Vin, Cout]."""
    return _forward_impl(x, params, vmem_limit=_vmem_limit_bytes())


# ----------------------------------------------------------------------------
# Parameters + pure-JAX f32 reference (for a loose correctness check)
# ----------------------------------------------------------------------------
def init_params(key, in_channels, middle_channels, out_channels, kernel_size,
                n_vertices_out):
    """Deterministic synthetic parameters (kaiming-like std for conv weights)."""
    k0, k1, k2, _ = jax.random.split(key, 4)

    def conv_init(k, cin, cout):
        std = (2.0 / (cin * kernel_size)) ** 0.5
        w = jax.random.normal(k, (cin, kernel_size, cout), jnp.float32) * std
        b = jnp.zeros((cout,), jnp.float32)
        return w, b

    w1, b1 = conv_init(k0, in_channels, middle_channels)
    w2, b2 = conv_init(k1, middle_channels, out_channels)
    gamma = jnp.ones((middle_channels,), jnp.float32)
    beta = jnp.zeros((middle_channels,), jnp.float32)

    # Synthetic dense, symmetric, rescaled graph Laplacian on the unpooled sphere.
    a = jax.random.normal(k2, (n_vertices_out, n_vertices_out), jnp.float32)
    lap = (a + a.T) * 0.5
    lap = lap / (jnp.linalg.norm(lap, ord=2) + 1e-6)
    return dict(w1=w1, b1=b1, gamma=gamma, beta=beta, w2=w2, b2=b2, lap=lap)


def _reference_forward(x, params):
    """Pure-JAX f32 reference of the PyTorch forward (training-mode BN stats)."""
    def cheb(xb, lap, w, b):
        K = w.shape[1]
        t0 = xb
        terms = [t0]
        if K > 1:
            t1 = jnp.einsum("vu,bui->bvi", lap, t0)
            terms.append(t1)
            for _ in range(2, K):
                t2 = 2.0 * jnp.einsum("vu,bui->bvi", lap, t1) - t0
                terms.append(t2)
                t0, t1 = t1, t2
        stacked = jnp.stack(terms, axis=2)                 # [B, V, K, Fin]
        return jnp.einsum("bvki,iko->bvo", stacked, w) + b

    xr = jnp.repeat(x, 4, axis=1)
    y = cheb(xr, params["lap"], params["w1"], params["b1"])
    mean = jnp.mean(y, axis=(0, 1))
    var = jnp.mean((y - mean) ** 2, axis=(0, 1))
    y = (y - mean) * jax.lax.rsqrt(var + _BN_EPS) * params["gamma"] + params["beta"]
    y = jnp.maximum(y, 0.0)
    return cheb(y, params["lap"], params["w2"], params["b2"])


if __name__ == "__main__":
    key = jax.random.PRNGKey(0)
    kx, kp = jax.random.split(key)

    batch = 2
    n_vertices_in = 16          # before unpooling; after unpool: 64
    in_channels = 4
    middle_channels = 8
    out_channels = 6
    kernel_size = 3

    x = jax.random.normal(kx, (batch, n_vertices_in, in_channels), jnp.float32)
    params = init_params(kp, in_channels, middle_channels, out_channels,
                         kernel_size, n_vertices_out=4 * n_vertices_in)

    out = spherical_cheb_bn_pool_cheb(x, params)
    out = jax.block_until_ready(out)
    assert out.shape == (batch, 4 * n_vertices_in, out_channels), out.shape
    assert bool(jnp.all(jnp.isfinite(out)))

    # Loose tolerance: kernel uses bf16 MXU inputs with f32 accumulation.
    ref = _reference_forward(x, params)
    err = float(jnp.max(jnp.abs(out - ref)))
    assert err < 1e-1, f"max abs error vs f32 reference: {err}"

    print("KERNEL_OK")
</pallas_src>

<mosaic_0001>
module attributes {stable_mosaic.version = 11 : i64} {
  func.func @kernel(%arg0: memref<16x8xf32, #tpu.memory_space<vmem>>, %arg1: memref<64x16xbf16, #tpu.memory_space<vmem>>, %arg2: memref<64x16xbf16, #tpu.memory_space<vmem>>, %arg3: memref<64x64xbf16, #tpu.memory_space<vmem>>, %arg4: memref<24x16xbf16, #tpu.memory_space<vmem>>, %arg5: memref<1x16xf32, #tpu.memory_space<vmem>>, %arg6: memref<1x16xf32, #tpu.memory_space<vmem>>, %arg7: memref<1x16xf32, #tpu.memory_space<vmem>>, %arg8: memref<16x8xf32, #tpu.memory_space<vmem>>, %arg9: memref<8x16xf32, #tpu.memory_space<vmem>>, %arg10: memref<48x128xbf16, #tpu.memory_space<vmem>>, %arg11: memref<1x128xf32, #tpu.memory_space<vmem>>, %arg12: memref<64x128xf32, #tpu.memory_space<vmem>>) attributes {dimension_semantics = [], scalar_prefetch = 0 : i64, scratch_operands = 0 : i64, tpu.core_type = #tpu.core_type<tc>} {
    %c0 = arith.constant 0 : index
    %c0_0 = arith.constant 0 : index
    %0 = vector.load %arg3[%c0, %c0_0] : memref<64x64xbf16, #tpu.memory_space<vmem>>, vector<64x64xbf16>
    %c0_1 = arith.constant 0 : index
    %c0_2 = arith.constant 0 : index
    %1 = vector.load %arg0[%c0_1, %c0_2] : memref<16x8xf32, #tpu.memory_space<vmem>>, vector<16x8xf32>
    %2 = arith.truncf %1 : vector<16x8xf32> to vector<16x8xbf16>
    %c0_3 = arith.constant 0 : index
    %c0_4 = arith.constant 0 : index
    %3 = vector.load %arg1[%c0_3, %c0_4] : memref<64x16xbf16, #tpu.memory_space<vmem>>, vector<64x16xbf16>
    %cst = arith.constant dense<0.000000e+00> : vector<64x8xf32>
    %4 = tpu.matmul %3, %2, %cst {dimension_numbers = #tpu.dot_dimension_numbers<[1], [0], [0], [1], [0, 0, 1, 1], [], []>} : vector<64x16xbf16>, vector<16x8xbf16>, vector<64x8xf32> -> vector<64x8xf32>
    %5 = arith.truncf %4 : vector<64x8xf32> to vector<64x8xbf16>
    %c0_5 = arith.constant 0 : index
    %c0_6 = arith.constant 0 : index
    %6 = vector.load %arg2[%c0_5, %c0_6] : memref<64x16xbf16, #tpu.memory_space<vmem>>, vector<64x16xbf16>
    %cst_7 = arith.constant dense<0.000000e+00> : vector<64x8xf32>
    %7 = tpu.matmul %6, %2, %cst_7 {dimension_numbers = #tpu.dot_dimension_numbers<[1], [0], [0], [1], [0, 0, 1, 1], [], []>} : vector<64x16xbf16>, vector<16x8xbf16>, vector<64x8xf32> -> vector<64x8xf32>
    %8 = arith.truncf %7 : vector<64x8xf32> to vector<64x8xbf16>
    %cst_8 = arith.constant dense<0.000000e+00> : vector<64x8xf32>
    %9 = tpu.matmul %0, %8, %cst_8 {dimension_numbers = #tpu.dot_dimension_numbers<[1], [0], [0], [1], [0, 0, 1, 1], [], []>} : vector<64x64xbf16>, vector<64x8xbf16>, vector<64x8xf32> -> vector<64x8xf32>
    %cst_9 = arith.constant 2.000000e+00 : f32
    %10 = vector.broadcast %cst_9 : f32 to vector<64x8xf32>
    %11 = arith.mulf %10, %9 : vector<64x8xf32>
    %12 = arith.subf %11, %4 : vector<64x8xf32>
    %13 = arith.truncf %12 : vector<64x8xf32> to vector<64x8xbf16>
    %14 = tpu.concatenate %5, %8, %13 in 1 : vector<64x8xbf16>, vector<64x8xbf16>, vector<64x8xbf16> -> vector<64x24xbf16>
    %c0_10 = arith.constant 0 : index
    %c0_11 = arith.constant 0 : index
    %15 = vector.load %arg4[%c0_10, %c0_11] : memref<24x16xbf16, #tpu.memory_space<vmem>>, vector<24x16xbf16>
    %cst_12 = arith.constant dense<0.000000e+00> : vector<64x16xf32>
    %16 = tpu.matmul %14, %15, %cst_12 {dimension_numbers = #tpu.dot_dimension_numbers<[1], [0], [0], [1], [0, 0, 1, 1], [], []>} : vector<64x24xbf16>, vector<24x16xbf16>, vector<64x16xf32> -> vector<64x16xf32>
    %c0_13 = arith.constant 0 : index
    %c0_14 = arith.constant 0 : index
    %17 = vector.load %arg5[%c0_13, %c0_14] : memref<1x16xf32, #tpu.memory_space<vmem>>, vector<1x16xf32>
    %18 = vector.broadcast %17 : vector<1x16xf32> to vector<64x16xf32>
    %19 = arith.addf %16, %18 : vector<64x16xf32>
    %cst_15 = arith.constant dense<0.000000e+00> : vector<16xf32>
    %20 = vector.multi_reduction <add>, %19, %cst_15 [0] : vector<64x16xf32> to vector<16xf32>
    %21 = vector.shape_cast %20 : vector<16xf32> to vector<1x16xf32>
    %c0_16 = arith.constant 0 : index
    %c0_17 = arith.constant 0 : index
    %22 = vector.load %arg8[%c0_16, %c0_17] : memref<16x8xf32, #tpu.memory_space<vmem>>, vector<16x8xf32>
    %cst_18 = arith.constant dense<0.000000e+00> : vector<1x8xf32>
    %23 = tpu.matmul %21, %22, %cst_18 {dimension_numbers = #tpu.dot_dimension_numbers<[1], [0], [0], [1], [0, 0, 1, 1], [], []>} : vector<1x16xf32>, vector<16x8xf32>, vector<1x8xf32> -> vector<1x8xf32>
    %cst_19 = arith.constant 7.812500e-03 : f32
    %24 = vector.broadcast %cst_19 : f32 to vector<1x8xf32>
    %25 = arith.mulf %23, %24 : vector<1x8xf32>
    %c0_20 = arith.constant 0 : index
    %c0_21 = arith.constant 0 : index
    %26 = vector.load %arg9[%c0_20, %c0_21] : memref<8x16xf32, #tpu.memory_space<vmem>>, vector<8x16xf32>
    %cst_22 = arith.constant dense<0.000000e+00> : vector<1x16xf32>
    %27 = tpu.matmul %25, %26, %cst_22 {dimension_numbers = #tpu.dot_dimension_numbers<[1], [0], [0], [1], [0, 0, 1, 1], [], []>} : vector<1x8xf32>, vector<8x16xf32>, vector<1x16xf32> -> vector<1x16xf32>
    %28 = vector.broadcast %27 : vector<1x16xf32> to vector<64x16xf32>
    %29 = arith.subf %19, %28 : vector<64x16xf32>
    %30 = arith.mulf %29, %29 : vector<64x16xf32>
    %cst_23 = arith.constant dense<0.000000e+00> : vector<16xf32>
    %31 = vector.multi_reduction <add>, %30, %cst_23 [0] : vector<64x16xf32> to vector<16xf32>
    %32 = vector.shape_cast %31 : vector<16xf32> to vector<1x16xf32>
    %c0_24 = arith.constant 0 : index
    %c0_25 = arith.constant 0 : index
    %33 = vector.load %arg8[%c0_24, %c0_25] : memref<16x8xf32, #tpu.memory_space<vmem>>, vector<16x8xf32>
    %cst_26 = arith.constant dense<0.000000e+00> : vector<1x8xf32>
    %34 = tpu.matmul %32, %33, %cst_26 {dimension_numbers = #tpu.dot_dimension_numbers<[1], [0], [0], [1], [0, 0, 1, 1], [], []>} : vector<1x16xf32>, vector<16x8xf32>, vector<1x8xf32> -> vector<1x8xf32>
    %cst_27 = arith.constant 7.812500e-03 : f32
    %35 = vector.broadcast %cst_27 : f32 to vector<1x8xf32>
    %36 = arith.mulf %34, %35 : vector<1x8xf32>
    %cst_28 = arith.constant 9.99999974E-6 : f32
    %37 = vector.broadcast %cst_28 : f32 to vector<1x8xf32>
    %38 = arith.addf %36, %37 : vector<1x8xf32>
    %39 = math.rsqrt %38 : vector<1x8xf32>
    %c0_29 = arith.constant 0 : index
    %c0_30 = arith.constant 0 : index
    %40 = vector.load %arg9[%c0_29, %c0_30] : memref<8x16xf32, #tpu.memory_space<vmem>>, vector<8x16xf32>
    %cst_31 = arith.constant dense<0.000000e+00> : vector<1x16xf32>
    %41 = tpu.matmul %39, %40, %cst_31 {dimension_numbers = #tpu.dot_dimension_numbers<[1], [0], [0], [1], [0, 0, 1, 1], [], []>} : vector<1x8xf32>, vector<8x16xf32>, vector<1x16xf32> -> vector<1x16xf32>
    %42 = vector.broadcast %41 : vector<1x16xf32> to vector<64x16xf32>
    %43 = arith.mulf %29, %42 : vector<64x16xf32>
    %c0_32 = arith.constant 0 : index
    %c0_33 = arith.constant 0 : index
    %44 = vector.load %arg6[%c0_32, %c0_33] : memref<1x16xf32, #tpu.memory_space<vmem>>, vector<1x16xf32>
    %45 = vector.broadcast %44 : vector<1x16xf32> to vector<64x16xf32>
    %46 = arith.mulf %43, %45 : vector<64x16xf32>
    %c0_34 = arith.constant 0 : index
    %c0_35 = arith.constant 0 : index
    %47 = vector.load %arg7[%c0_34, %c0_35] : memref<1x16xf32, #tpu.memory_space<vmem>>, vector<1x16xf32>
    %48 = vector.broadcast %47 : vector<1x16xf32> to vector<64x16xf32>
    %49 = arith.addf %46, %48 : vector<64x16xf32>
    %cst_36 = arith.constant 0.000000e+00 : f32
    %50 = vector.broadcast %cst_36 : f32 to vector<64x16xf32>
    %51 = arith.maximumf %49, %50 : vector<64x16xf32>
    %52 = arith.truncf %51 : vector<64x16xf32> to vector<64x16xbf16>
    %cst_37 = arith.constant dense<0.000000e+00> : vector<64x16xf32>
    %53 = tpu.matmul %0, %52, %cst_37 {dimension_numbers = #tpu.dot_dimension_numbers<[1], [0], [0], [1], [0, 0, 1, 1], [], []>} : vector<64x64xbf16>, vector<64x16xbf16>, vector<64x16xf32> -> vector<64x16xf32>
    %54 = arith.truncf %53 : vector<64x16xf32> to vector<64x16xbf16>
    %cst_38 = arith.constant dense<0.000000e+00> : vector<64x16xf32>
    %55 = tpu.matmul %0, %54, %cst_38 {dimension_numbers = #tpu.dot_dimension_numbers<[1], [0], [0], [1], [0, 0, 1, 1], [], []>} : vector<64x64xbf16>, vector<64x16xbf16>, vector<64x16xf32> -> vector<64x16xf32>
    %cst_39 = arith.constant 2.000000e+00 : f32
    %56 = vector.broadcast %cst_39 : f32 to vector<64x16xf32>
    %57 = arith.mulf %56, %55 : vector<64x16xf32>
    %58 = arith.subf %57, %51 : vector<64x16xf32>
    %59 = arith.truncf %58 : vector<64x16xf32> to vector<64x16xbf16>
    %60 = tpu.concatenate %52, %54, %59 in 1 : vector<64x16xbf16>, vector<64x16xbf16>, vector<64x16xbf16> -> vector<64x48xbf16>
    %c0_40 = arith.constant 0 : index
    %c0_41 = arith.constant 0 : index
    %61 = vector.load %arg10[%c0_40, %c0_41] : memref<48x128xbf16, #tpu.memory_space<vmem>>, vector<48x128xbf16>
    %cst_42 = arith.constant dense<0.000000e+00> : vector<64x128xf32>
    %62 = tpu.matmul %60, %61, %cst_42 {dimension_numbers = #tpu.dot_dimension_numbers<[1], [0], [0], [1], [0, 0, 1, 1], [], []>} : vector<64x48xbf16>, vector<48x128xbf16>, vector<64x128xf32> -> vector<64x128xf32>
    %c0_43 = arith.constant 0 : index
    %c0_44 = arith.constant 0 : index
    %63 = vector.load %arg11[%c0_43, %c0_44] : memref<1x128xf32, #tpu.memory_space<vmem>>, vector<1x128xf32>
    %64 = vector.broadcast %63 : vector<1x128xf32> to vector<64x128xf32>
    %65 = arith.addf %62, %64 : vector<64x128xf32>
    %c0_45 = arith.constant 0 : index
    %c0_46 = arith.constant 0 : index
    %66 = vector.load %arg12[%c0_45, %c0_46] : memref<64x128xf32, #tpu.memory_space<vmem>>, vector<64x128xf32>
    tpu.vector_store %arg12[%c0_45, %c0_46], %65 {strides = array<i32>} : memref<64x128xf32, #tpu.memory_space<vmem>>, vector<64x128xf32>,
    return
  }
}

</mosaic_0001>

<bundles_post_ra>
// kernel: tile.28
= control target key start
LH: loop header
LB: loop body
LE: loop exit
PB: predicated region body
PF: predicated region fallthrough
CT: control target
= control target key end

     0   :  { %s22_s0 = inlined_call_operand.vmem [shape: f32[8], index: 0, kind: input, shape index: {}]   ;;  %s23_s1 = inlined_call_operand.vmem [shape: f32[2,8], index: 1, kind: output, shape index: {}]  }
   0x1   :  { %v4_v0 = vld [vmem:[%s22_s0] ss:$0 sm:$0xff] }
   0x2   :  { %5 = vst [vmem:[%s23_s1] sm:$0x3] %v4_v0 }

// kernel: tile.29
= control target key start
LH: loop header
LB: loop body
LE: loop exit
PB: predicated region body
PF: predicated region fallthrough
CT: control target
= control target key end

     0   :  { %vm7_vm0 = vcmask 64512   ;;  %vm13_vm1 = vcmask 130112   ;;  %s39_s0 = inlined_call_operand.vmem [shape: f32[2,8], index: 0, kind: input, shape index: {}]   ;;  %s40_s1 = inlined_call_operand.vmem [shape: f32[1,16], index: 1, kind: output, shape index: {}]  }
   0x1   :  { %v4_v0 = vld [vmem:[%s39_s0] sm:$0x3]  ;;  %s22_s0 = smov 8  }
   0x2   :  { %5 = vst [vmem:[#allocation1] sm:$0x3] %v4_v0 }
   0x9   :  { %v10_v1 = vld [vmem:[#allocation1 + $0x1] sm:$0x1]   ;;  %v6_v2 = vld [vmem:[#allocation1] sm:$0x1]  }
   0xa   :  { %11 = vrot.lane.b32.xlu0 %v10_v1, %s22_s0  ;;  %8 = vst.msk [vmem:[#allocation0] sm:$0x1] %vm7_vm0, %v6_v2  }
  0x7c   :  { %v12_v3 = vpop.permute.xlu0 %11  }
  0x7d   :  { %14 = vst.msk [vmem:[#allocation0] sm:$0x1] %vm13_vm1, %v12_v3  }
  0x84   :  { %v18_v4 = vld [vmem:[#allocation0] sm:$0x1] }
  0x85   :  { %20 = vst [vmem:[%s40_s1] sm:$0x1] %v18_v4 }

// kernel: tile.33
= control target key start
LH: loop header
LB: loop body
LE: loop exit
PB: predicated region body
PF: predicated region fallthrough
CT: control target
= control target key end

     0   :  { %s22_s0 = inlined_call_operand.vmem [shape: f32[6], index: 0, kind: input, shape index: {}]   ;;  %s23_s1 = inlined_call_operand.vmem [shape: f32[2,6], index: 1, kind: output, shape index: {}]  }
   0x1   :  { %v4_v0 = vld [vmem:[%s22_s0] ss:$0 sm:$0xff] }
   0x2   :  { %5 = vst [vmem:[%s23_s1] sm:$0x3] %v4_v0 }

// kernel: tile.34
= control target key start
LH: loop header
LB: loop body
LE: loop exit
PB: predicated region body
PF: predicated region fallthrough
CT: control target
= control target key end

     0   :  { %vm7_vm0 = vcmask 48128   ;;  %vm13_vm1 = vcmask 97328   ;;  %s39_s0 = inlined_call_operand.vmem [shape: f32[2,6], index: 0, kind: input, shape index: {}]   ;;  %s40_s1 = inlined_call_operand.vmem [shape: f32[12], index: 1, kind: output, shape index: {}]  }
   0x1   :  { %v4_v0 = vld [vmem:[%s39_s0] sm:$0x3]  ;;  %s22_s0 = smov 6  }
   0x2   :  { %5 = vst [vmem:[#allocation1] sm:$0x3] %v4_v0 }
   0x9   :  { %v10_v1 = vld [vmem:[#allocation1 + $0x1] sm:$0x1]   ;;  %v6_v2 = vld [vmem:[#allocation1] sm:$0x1]  }
   0xa   :  { %11 = vrot.lane.b32.xlu0 %v10_v1, %s22_s0  ;;  %8 = vst.msk [vmem:[#allocation0] sm:$0x1] %vm7_vm0, %v6_v2  }
  0x7c   :  { %v12_v3 = vpop.permute.xlu0 %11  }
  0x7d   :  { %14 = vst.msk [vmem:[#allocation0] sm:$0x1] %vm13_vm1, %v12_v3  }
  0x84   :  { %v18_v4 = vld [vmem:[#allocation0] sm:$0x1] }
  0x85   :  { %20 = vst [vmem:[%s40_s1] sm:$0x1] %v18_v4 }

// kernel: tile.49
= control target key start
LH: loop header
LB: loop body
LE: loop exit
PB: predicated region body
PF: predicated region fallthrough
CT: control target
= control target key end

     0   :  { %vm42_vm0 = vcmask 1047556   ;;  %vm44_vm1 = vcmask 64512   ;;  %vm54_vm2 = vcmask 130112   ;;  %s111_s0 = inlined_call_operand.vmem [shape: f32[2,8,8], index: 0, kind: input, shape index: {}]   ;;  %s112_s1 = inlined_call_operand.vmem [shape: f32[16,8], index: 1, kind: output, shape index: {}]  }
   0x1   :  { %v62_v0 = vld [vmem:[%s111_s0 + $0xe] sm:$0x3]  ;;  %v63_v1 = vld [vmem:[%s111_s0 + $0xc] sm:$0x3]  ;;  %v64_v2 = vld [vmem:[%s111_s0 + $0xa] sm:$0x3] }
   0x2   :  { %8 = vst [vmem:[#allocation0 + $0x38] sm:$0x3] %v62_v0  ;;  %13 = vst [vmem:[#allocation0 + $0x30] sm:$0x3] %v63_v1  ;;  %v65_v3 = vld [vmem:[%s111_s0 + $0x8] sm:$0x3] }
   0x3   :  { %18 = vst [vmem:[#allocation0 + $0x28] sm:$0x3] %v64_v2  ;;  %v66_v4 = vld [vmem:[%s111_s0 + $0x6] sm:$0x3]  ;;  %v67_v5 = vld [vmem:[%s111_s0 + $0x4] sm:$0x3] }
   0x4   :  { %23 = vst [vmem:[#allocation0 + $0x20] sm:$0x3] %v65_v3  ;;  %28 = vst [vmem:[#allocation0 + $0x18] sm:$0x3] %v66_v4  ;;  %v68_v6 = vld [vmem:[%s111_s0 + $0x2] sm:$0x3] }
   0x5   :  { %33 = vst [vmem:[#allocation0 + $0x10] sm:$0x3] %v67_v5  ;;  %v38_v7 = vld [vmem:[%s111_s0] sm:$0x3]  ;;  %37 = vst [vmem:[#allocation0 + $0x8] sm:$0x3] %v68_v6 }
   0x6   :  { %39 = vst [vmem:[#allocation0] sm:$0x3] %v38_v7  ;;  %s70_s0 = smov 8  }
   0xb   :  { %v41_v8 = vld [vmem:[#allocation0] ss:$8 sm:$0xf0]   ;;  %v49_v9 = vld [vmem:[#allocation0 + $0x1] ss:$8 sm:$0xf0]  }
   0xd   :  { %v40_v10 = vld [vmem:[#allocation0] ss:$8 sm:$0xf]   ;;  %v47_v11 = vld [vmem:[#allocation0 + $0x1] ss:$8 sm:$0xf]  }
   0xe   :  { %v43_v12 = vsel %vm42_vm0, %v41_v8, %v40_v10  ;;  %v51_v13 = vsel %vm42_vm0, %v49_v9, %v47_v11 }
   0xf   :  { %52 = vrot.lane.b32.xlu0 %v51_v13, %s70_s0  ;;  %45 = vst.msk [vmem:[%s112_s1] sm:$0xff] %vm44_vm1, %v43_v12  }
  0x81   :  { %v53_v14 = vpop.permute.xlu0 %52  }
  0x82   :  { %55 = vst.msk [vmem:[%s112_s1] sm:$0xff] %vm54_vm2, %v53_v14  }

// kernel: _forward_impl.1
= control target key start
LH: loop header
LB: loop body
LE: loop exit
PB: predicated region body
PF: predicated region fallthrough
CT: control target
= control target key end

     0   :  { %vm81_vm0 = vcmask 130048   ;;  %vm292_vm1 = vcmask 523264   ;;  %vm463_vm2 = vcmask 1043456   ;;  %vm414_vm3 = vcmask 64512   ;;  %s1924_s0 = inlined_call_operand.vmem [shape: f32[16,8], index: 0, kind: input, shape index: {}]   ;;  %s1925_s2 = inlined_call_operand.vmem [shape: bf16[64,16], index: 2, kind: input, shape index: {}]   ;;  %s1926_s1 = inlined_call_operand.vmem [shape: bf16[64,16], index: 1, kind: input, shape index: {}]   ;;  %s1927_s3 = inlined_call_operand.vmem [shape: bf16[64,64], index: 3, kind: input, shape index: {}]   ;;  %s1928_s4 = inlined_call_operand.vmem [shape: bf16[24,16], index: 4, kind: input, shape index: {}]   ;;  %s1929_s8 = inlined_call_operand.vmem [shape: f32[16,8], index: 8, kind: input, shape index: {}]   ;;  %s1930_s9 = inlined_call_operand.vmem [shape: f32[8,16], index: 9, kind: input, shape index: {}]   ;;  %s1931_s5 = inlined_call_operand.vmem [shape: f32[1,16], index: 5, kind: input, shape index: {}]   ;;  %s1932_s6 = inlined_call_operand.vmem [shape: f32[1,16], index: 6, kind: input, shape index: {}]   ;;  %s1933_s7 = inlined_call_operand.vmem [shape: f32[1,16], index: 7, kind: input, shape index: {}]   ;;  %s1934_s10 = inlined_call_operand.vmem [shape: bf16[48,128], index: 10, kind: input, shape index: {}]   ;;  %s1935_s11 = inlined_call_operand.vmem [shape: f32[1,128], index: 11, kind: input, shape index: {}]   ;;  %s1936_s12 = inlined_call_operand.vmem [shape: f32[64,128], index: 12, kind: output, shape index: {}]  }
   0x1   :  { %v50_v0 = vld [vmem:[%s1924_s0] sm:$0xff]  ;;  %v51_v1 = vld [vmem:[%s1924_s0 + $0x8] sm:$0xff]  ;;  %v1514_v5 = vld [vmem:[%s1925_s2 + $0x10] sm:$0xff]   ;;  %vm454_vm4 = vcmask 195584   ;;  %vm1534_vm5 = vmmov 0   ;;  %vm1137_vm6 = vcmask 261120  }
   0x2   :  { %v52_v2 = vpack.c.bf16 %v51_v1, %v50_v0  ;;  %v1512_v3 = vld [vmem:[%s1925_s2] sm:$0xff]   ;;  %v1513_v4 = vld [vmem:[%s1925_s2 + $0x8] sm:$0xff]   ;;  %v1518_v8 = vld [vmem:[%s1926_s1 + $0x10] sm:$0xff]   ;;  %vm1177_vm7 = vcmask 392192  }
   0x3   :  { %1385 = vmatprep.mubr.msk.bf16.mxu1 %vm81_vm0, %v1512_v3  ;;  %v1516_v6 = vld [vmem:[%s1926_s1] sm:$0xff]   ;;  %v1517_v7 = vld [vmem:[%s1926_s1 + $0x8] sm:$0xff]   ;;  %v1515_v9 = vld [vmem:[%s1925_s2 + $0x18] sm:$0xff]  }
   0x4   :  { %1383 = vmatprep.subr.bf16.mxu1 %v52_v2  ;;  %1373 = vmatprep.subr.bf16.mxu0 %v52_v2  ;;  %v1519_v10 = vld [vmem:[%s1926_s1 + $0x18] sm:$0xff]   ;;  %v1643_v11 = vld [vmem:[%s1927_s3] sm:$0xff]   ;;  %v1648_v12 = vld [vmem:[%s1927_s3 + $0x10] sm:$0xff]   ;;  %s1531_s1 = smov 8  }
   0x5   :  { %1384 = vmatpush3.bf16.msra.mxu1 %v52_v2  ;;  %1374 = vmatpush3.bf16.msra.mxu0 %v52_v2  ;;  %v1684_v37 = vld [vmem:[%s1927_s3 + $0x8] sm:$0xff]   ;;  %v1689_v38 = vld [vmem:[%s1927_s3 + $0x18] sm:$0xff]   ;;  %v1524_v39 = vld [vmem:[%s1928_s4] sm:$0xff]   ;;  %s1532_s3 = smov 16  }
   0x6   :  { %1375 = vmatprep.mubr.msk.bf16.mxu0 %vm81_vm0, %v1516_v6  ;;  %v1525_v40 = vld [vmem:[%s1928_s4 + $0x8] ss:$0 sps:$4 sm:$0xff]  }
   0x7   :  { %v465_v41 = vsel %vm463_vm2, %v1525_v40, 0 }
   0x8   :  { %1386 = vmatmul.mubr.msk.bf16.vlgmr.msra.gmra.mrb[0].mxu1 %vm81_vm0, %v1513_v4  ;;  %1376 = vmatmul.mubr.msk.bf16.vlgmr.msra.gmra.mrb[0].mxu0 %vm81_vm0, %v1517_v7 }
   0x9   :  { %1389 = vmatprep.mubr.msk.bf16.mxu1 %vm81_vm0, %v1514_v5  ;;  %1379 = vmatprep.mubr.msk.bf16.mxu0 %vm81_vm0, %v1518_v8 }
  0x10   :  { %1390 = vmatmul.mubr.msk.bf16.gmra.mrb[4].mxu1 %vm81_vm0, %v1515_v9  ;;  %1380 = vmatmul.mubr.msk.bf16.gmra.mrb[4].mxu0 %vm81_vm0, %v1519_v10 }
  0x11   :  { %1401 = vmatprep.mubr.msk.bf16.mxu0 %vm292_vm1, %v1643_v11  ;;  %1405 = vmatprep.mubr.msk.bf16.mxu1 %vm292_vm1, %v1648_v12 }
  0xdb   :  { %v1387_v13 = vpop.f32.mrb[0].mxu1  ;;  %v1654_v15 = vpop.f32.mrb[0].mxu0 }
  0xdc   :  { %v237_v14 = vpop.f32.mrb[1].mxu1  ;;  %v1656_v17 = vpop.f32.mrb[1].mxu0 }
  0xdd   :  { %v1388_v16 = vpop.f32.mrb[2].mxu1  ;;  %v1658_v20 = vpop.f32.mrb[2].mxu0 }
  0xde   :  { %v269_v18 = vpack.c.bf16 %v1388_v16, %v1387_v13  ;;  %v240_v19 = vpop.f32.mrb[3].mxu1  ;;  %v160_v22 = vpack.c.bf16 %v1658_v20, %v1654_v15  ;;  %v1662_v23 = vpop.f32.mrb[3].mxu0 }
  0xdf   :  { %v268_v21 = vpack.c.bf16 %v240_v19, %v237_v14  ;;  %v159_v24 = vpack.c.bf16 %v1662_v23, %v1656_v17 }
  0xe1   :  { %394 = vrot.lane.b32.xlu0 %v268_v21, %s1531_s1  ;;  %1393 = vmatprep.subr.bf16.mxu0 %v268_v21 }
  0xe2   :  { %1497 = vmatprep.subr.bf16.mxu1 %v268_v21  ;;  %1394 = vmatpush3.bf16.msra.mxu0 %v268_v21 }
  0xe3   :  { %1501 = vmatpush3.bf16.msra.mxu1 %v268_v21  ;;  %v1391_v25 = vpop.f32.mrb[4].mxu1  ;;  %1395 = vmatprep.subr.bf16.mxu0 %v269_v18  ;;  %v1667_v27 = vpop.f32.mrb[4].mxu0 }
  0xe4   :  { %1498 = vmatprep.subr.bf16.mxu1 %v269_v18  ;;  %v253_v26 = vpop.f32.mrb[5].mxu1  ;;  %v1670_v29 = vpop.f32.mrb[5].mxu0 }
  0xe5   :  { %396 = vrot.lane.b32.xlu0 %v269_v18, %s1531_s1  ;;  %v1392_v28 = vpop.f32.mrb[6].mxu1  ;;  %v1672_v32 = vpop.f32.mrb[6].mxu0 }
  0xe6   :  { %v271_v30 = vpack.c.bf16 %v1392_v28, %v1391_v25  ;;  %v256_v31 = vpop.f32.mrb[7].mxu1  ;;  %1396 = vmatpush3.bf16.msra.mxu0 %v269_v18  ;;  %v162_v34 = vpack.c.bf16 %v1672_v32, %v1667_v27  ;;  %v1676_v35 = vpop.f32.mrb[7].mxu0  ;;  %v554_v25 = vld [vmem:[%s1929_s8 + $0x8] sm:$0xff]  ;;  %v1533_v28 = vmov 0.0|0.0  }
  0xe7   :  { %v270_v33 = vpack.c.bf16 %v256_v31, %v253_v26  ;;  %1502 = vmatpush3.bf16.msra.mxu1 %v269_v18  ;;  %v161_v36 = vpack.c.bf16 %v1676_v35, %v1670_v29 }
  0xe9   :  { %398 = vrot.lane.b32.xlu0 %v270_v33, %s1531_s1  ;;  %1397 = vmatprep.subr.bf16.mxu0 %v270_v33 }
  0xea   :  { %1499 = vmatprep.subr.bf16.mxu1 %v270_v33  ;;  %1398 = vmatpush3.bf16.msra.mxu0 %v270_v33 }
  0xeb   :  { %1503 = vmatpush3.bf16.msra.mxu1 %v270_v33  ;;  %1399 = vmatprep.subr.bf16.mxu0 %v271_v30 }
  0xec   :  { %1500 = vmatprep.subr.bf16.mxu1 %v271_v30 }
  0xee   :  { %1400 = vmatpush3.bf16.msra.mxu0 %v271_v30 }
  0xef   :  { %1504 = vmatpush3.bf16.msra.mxu1 %v271_v30  ;;  %1491 = vmatprep.subr.bf16.mxu0 %v1533_v28 }
  0xf0   :  { %1409 = vmatprep.subr.bf16.mxu1 %v1524_v39 }
  0xf1   :  { %1402 = vmatmul.mubr.msk.bf16.vlgmr.msra.gmra.mrb[8].mxu0 %vm292_vm1, %v1684_v37 }
  0xf2   :  { %1406 = vmatmul.mubr.msk.bf16.vlgmr.msra.gmra.mrb[8].mxu1 %vm292_vm1, %v1689_v38 }
  0xf3   :  { %1410 = vmatpush3.bf16.msra.mxu1 %v1524_v39 }
  0xf4   :  { %1505 = vmatprep.subr.msk.bf16.mxu1 %vm463_vm2, %v1525_v40 }
  0xf7   :  { %1412 = vmatpush3.bf16.msra.mxu1 %v465_v41 }
 0x153   :  { %v395_v6 = vpop.permute.xlu0 %394 }
 0x154   :  { %v417_v9 = vsel %vm414_vm3, %v159_v24, %v395_v6  ;;  %v553_v24 = vld [vmem:[%s1929_s8] sm:$0xff] }
 0x155   :  { %v1492_v26 = vpack.c.bf16 %v554_v25, %v553_v24 }
 0x157   :  { %v397_v7 = vpop.permute.xlu0 %396  ;;  %1493 = vmatpush3.bf16.msra.mxu0 %v1492_v26 }
 0x158   :  { %v420_v16 = vsel %vm414_vm3, %v160_v22, %v397_v7  ;;  %1494 = vmatprep.subr.bf16.mxu0 %v1533_v28 }
 0x15b   :  { %v399_v8 = vpop.permute.xlu0 %398 }
 0x15c   :  { %v423_v19 = vsel %vm414_vm3, %v161_v36, %v399_v8 }
 0x1c4   :  { %v1403_v42 = vpop.f32.mrb[8].mxu0 }
 0x1c5   :  { %v372_v43 = vmul.f32 2.0, %v1403_v42  ;;  %v1407_v44 = vpop.f32.mrb[8].mxu1  ;;  %v339_v45 = vpop.f32.mrb[9].mxu0 }
 0x1c6   :  { %v376_v46 = vmul.f32 2.0, %v1407_v44  ;;  %v370_v47 = vmul.f32 2.0, %v339_v45  ;;  %v355_v48 = vpop.f32.mrb[9].mxu1  ;;  %v1404_v49 = vpop.f32.mrb[10].mxu0 }
 0x1c7   :  { %v380_v50 = vsub.f32 %v372_v43, %v1654_v15  ;;  %v374_v51 = vmul.f32 2.0, %v355_v48  ;;  %v373_v52 = vmul.f32 2.0, %v1404_v49  ;;  %v1408_v53 = vpop.f32.mrb[10].mxu1  ;;  %v342_v54 = vpop.f32.mrb[11].mxu0 }
 0x1c8   :  { %v384_v55 = vsub.f32 %v376_v46, %v1667_v27  ;;  %v378_v56 = vsub.f32 %v370_v47, %v1656_v17  ;;  %v377_v57 = vmul.f32 2.0, %v1408_v53  ;;  %v371_v58 = vmul.f32 2.0, %v342_v54  ;;  %v358_v59 = vpop.f32.mrb[11].mxu1 }
 0x1c9   :  { %v382_v60 = vsub.f32 %v374_v51, %v1670_v29  ;;  %v381_v61 = vsub.f32 %v373_v52, %v1658_v20  ;;  %v375_v62 = vmul.f32 2.0, %v358_v59  ;;  %v1535_v27 = vmov 0.0   ;;  %v629_v29 = vld [vmem:[%s1930_s9] sm:$0xff] }
 0x1ca   :  { %v385_v63 = vsub.f32 %v377_v57, %v1672_v32  ;;  %v379_v0 = vsub.f32 %v371_v58, %v1662_v23  ;;  %1425 = vmatprep.mubr.msk.f32.mxu0 %vm1534_vm5, %v1535_v27  ;;  %1428 = vmatprep.subr.mxu1 %v1535_v27 }
 0x1cb   :  { %v383_v1 = vsub.f32 %v375_v62, %v1676_v35  ;;  %v387_v2 = vpack.c.bf16 %v381_v61, %v380_v50 }
 0x1cc   :  { %v386_v3 = vpack.c.bf16 %v379_v0, %v378_v56  ;;  %v389_v4 = vpack.c.bf16 %v385_v63, %v384_v55 }
 0x1cd   :  { %v388_v5 = vpack.c.bf16 %v383_v1, %v382_v60 }
 0x1ce   :  { %406 = vrot.lane.b32.xlu1 %v386_v3, %s1532_s3 }
 0x1cf   :  { %410 = vrot.lane.b32.xlu0 %v388_v5, %s1532_s3 }
 0x1d2   :  { %408 = vrot.lane.b32.xlu1 %v387_v2, %s1532_s3 }
 0x1d6   :  { %400 = vrot.lane.b32.xlu1 %v271_v30, %s1531_s1  ;;  %v1287_v30 = vld [vmem:[%s1931_s5] ss:$0 sm:$0xff] }
 0x1da   :  { %412 = vrot.lane.b32.xlu1 %v389_v4, %s1532_s3 }
 0x240   :  { %v407_v10 = vpop.permute.xlu1 %406 }
 0x241   :  { %v428_v13 = vsel %vm81_vm0, %v417_v9, %v407_v10  ;;  %v411_v14 = vpop.permute.xlu0 %410  ;;  %v703_v9 = vlaneseq }
 0x242   :  { %1413 = vmatprep.mubr.msk.bf16.mxu1 %vm454_vm4, %v428_v13  ;;  %v432_v21 = vsel %vm81_vm0, %v423_v19, %v411_v14 }
 0x243   :  { %v704_v10 = vshrl.u32 %v703_v9, 7 }
 0x244   :  { %v409_v18 = vpop.permute.xlu1 %408 }
 0x245   :  { %v430_v17 = vsel %vm81_vm0, %v420_v16, %v409_v18  ;;  %v705_v13 = vsub.s32 0, %v704_v10 }
 0x246   :  { %1414 = vmatmul.mubr.msk.bf16.vlgmr.msra.gmra.mrb[12].mxu1 %vm454_vm4, %v430_v17 }
 0x247   :  { %1417 = vmatprep.mubr.msk.bf16.mxu1 %vm454_vm4, %v432_v21  ;;  %1429 = vmatpush3.msra.mxu1 %v629_v29 }
 0x248   :  { %v401_v23 = vpop.permute.xlu1 %400  ;;  %1440 = vmatprep.subr.mxu1 %v1535_v27 }
 0x249   :  { %v426_v15 = vsel %vm414_vm3, %v162_v34, %v401_v23 }
 0x24c   :  { %v413_v20 = vpop.permute.xlu1 %412 }
 0x24d   :  { %v434_v22 = vsel %vm81_vm0, %v426_v15, %v413_v20 }
 0x24e   :  { %1418 = vmatmul.mubr.msk.bf16.gmra.mrb[16].mxu1 %vm454_vm4, %v434_v22 }
 0x24f   :  { %1430 = vmatprep.mubr.msk.f32.mxu1 %vm1534_vm5, %v1535_v27 }
 0x319   :  { %v1415_v31 = vpop.f32.mrb[12].mxu1 }
 0x31a   :  { %v501_v32 = vpop.f32.mrb[13].mxu1  ;;  %v510_v36 = vadd.f32 %v1415_v31, %v1287_v30 }
 0x31b   :  { %v502_v33 = vadd.f32 %v1287_v30, %v501_v32  ;;  %v1416_v34 = vpop.f32.mrb[14].mxu1 }
 0x31c   :  { %v504_v35 = vpop.f32.mrb[15].mxu1  ;;  %v513_v41 = vadd.f32 %v1416_v34, %v1287_v30  ;;  %v535_v44 = vsel %vm81_vm0, %v510_v36, 0.0 }
 0x31d   :  { %v505_v39 = vadd.f32 %v1287_v30, %v504_v35  ;;  %v532_v40 = vsel %vm81_vm0, %v502_v33, 0.0 }
 0x31e   :  { %v537_v48 = vsel %vm81_vm0, %v513_v41, 0.0 }
 0x31f   :  { %v533_v42 = vsel %vm81_vm0, %v505_v39, 0.0 }
 0x320   :  { %v534_v43 = vadd.f32 %v533_v42, %v532_v40 }
 0x321   :  { %v1419_v45 = vpop.f32.mrb[16].mxu1 }
 0x322   :  { %v536_v46 = vadd.f32 %v535_v44, %v534_v43  ;;  %v517_v47 = vpop.f32.mrb[17].mxu1  ;;  %v526_v53 = vadd.f32 %v1419_v45, %v1287_v30 }
 0x323   :  { %v518_v49 = vadd.f32 %v1287_v30, %v517_v47  ;;  %v1420_v50 = vpop.f32.mrb[18].mxu1 }
 0x324   :  { %v538_v51 = vadd.f32 %v537_v48, %v536_v46  ;;  %v520_v52 = vpop.f32.mrb[19].mxu1  ;;  %v529_v57 = vadd.f32 %v1420_v50, %v1287_v30  ;;  %v543_v60 = vsel %vm81_vm0, %v526_v53, 0.0 }
 0x325   :  { %v539_v54 = vsel %vm81_vm0, %v518_v49, 0.0  ;;  %v521_v55 = vadd.f32 %v1287_v30, %v520_v52 }
 0x326   :  { %v540_v56 = vadd.f32 %v539_v54, %v538_v51  ;;  %v545_v62 = vsel %vm81_vm0, %v529_v57, 0.0 }
 0x327   :  { %v541_v58 = vsel %vm81_vm0, %v521_v55, 0.0 }
 0x328   :  { %v542_v59 = vadd.f32 %v541_v58, %v540_v56 }
 0x32a   :  { %v544_v61 = vadd.f32 %v543_v60, %v542_v59 }
 0x32c   :  { %v546_v63 = vadd.f32 %v545_v62, %v544_v61 }
 0x32e   :  { %v547_v0 = vrot.slane %v546_v63, 4 }
 0x330   :  { %v548_v1 = vadd.f32 %v547_v0, %v546_v63  ;;  %v1298_v0 = vld [vmem:[%s1932_s6] ss:$0 sm:$0xff] }
 0x332   :  { %v549_v2 = vrot.slane %v548_v1, 2 }
 0x334   :  { %v550_v3 = vadd.f32 %v549_v2, %v548_v1 }
 0x336   :  { %v551_v4 = vrot.slane %v550_v3, 1 }
 0x338   :  { %v552_v5 = vadd.f32 %v551_v4, %v550_v3 }
 0x33a   :  { %1426 = vmatmul.mubr.msk.f32.vlgmr.msra.gmra.mrb[12].mxu0 %vm81_vm0, %v552_v5  ;;  %v1299_v5 = vld [vmem:[%s1933_s7] ss:$0 sm:$0xff] }
 0x33b   :  { %1496 = vmatpush3.bf16.msra.mxu0 %v1492_v26  ;;  %1437 = vmatprep.mubr.msk.f32.mxu0 %vm1534_vm5, %v1535_v27 }
 0x40d   :  { %v624_v6 = vpop.f32.mrb[12].mxu0 }
 0x40e   :  { %v628_v7 = vmul.f32 0.0078125, %v624_v6  ;;  %v1427_v8 = vpop.f32.mrb[13].mxu0 }
 0x410   :  { %1431 = vmatmul.mubr.msk.f32.vlgmr.msra.gmra.mrb[20].mxu1 %vm414_vm3, %v628_v7 }
 0x411   :  { %1441 = vmatpush3.msra.mxu1 %v629_v29  ;;  %1442 = vmatprep.mubr.msk.f32.mxu1 %vm1534_vm5, %v1535_v27 }
 0x4e3   :  { %v699_v14 = vpop.f32.mrb[20].mxu1 }
 0x4e4   :  { %v706_v16 = vrot.slane %v699_v14, %v705_v13  ;;  %v1432_v18 = vpop.f32.mrb[21].mxu1 }
 0x4e6   :  { %v707_v19 = vsub.f32 %v502_v33, %v706_v16  ;;  %v708_v17 = vsub.f32 %v505_v39, %v706_v16  ;;  %v709_v21 = vsub.f32 %v510_v36, %v706_v16  ;;  %v710_v23 = vsub.f32 %v513_v41, %v706_v16 }
 0x4e7   :  { %v711_v15 = vsub.f32 %v518_v49, %v706_v16  ;;  %v712_v25 = vsub.f32 %v521_v55, %v706_v16  ;;  %v713_v30 = vsub.f32 %v526_v53, %v706_v16  ;;  %v714_v33 = vsub.f32 %v529_v57, %v706_v16 }
 0x4e8   :  { %v715_v20 = vmul.f32 %v707_v19, %v707_v19  ;;  %v716_v22 = vmul.f32 %v708_v17, %v708_v17  ;;  %v717_v24 = vmul.f32 %v709_v21, %v709_v21  ;;  %v718_v26 = vmul.f32 %v710_v23, %v710_v23 }
 0x4e9   :  { %v719_v31 = vmul.f32 %v711_v15, %v711_v15  ;;  %v720_v35 = vmul.f32 %v712_v25, %v712_v25  ;;  %v721_v40 = vmul.f32 %v713_v30, %v713_v30  ;;  %v722_v43 = vmul.f32 %v714_v33, %v714_v33 }
 0x4ea   :  { %v723_v28 = vsel %vm81_vm0, %v715_v20, 0.0  ;;  %v724_v27 = vsel %vm81_vm0, %v716_v22, 0.0  ;;  %v726_v32 = vsel %vm81_vm0, %v717_v24, 0.0  ;;  %v728_v36 = vsel %vm81_vm0, %v718_v26, 0.0 }
 0x4eb   :  { %v725_v29 = vadd.f32 %v724_v27, %v723_v28  ;;  %v730_v41 = vsel %vm81_vm0, %v719_v31, 0.0  ;;  %v732_v44 = vsel %vm81_vm0, %v720_v35, 0.0  ;;  %v734_v46 = vsel %vm81_vm0, %v721_v40, 0.0 }
 0x4ec   :  { %v736_v48 = vsel %vm81_vm0, %v722_v43, 0.0 }
 0x4ed   :  { %v727_v34 = vadd.f32 %v726_v32, %v725_v29 }
 0x4ef   :  { %v729_v39 = vadd.f32 %v728_v36, %v727_v34 }
 0x4f1   :  { %v731_v42 = vadd.f32 %v730_v41, %v729_v39 }
 0x4f3   :  { %v733_v45 = vadd.f32 %v732_v44, %v731_v42 }
 0x4f5   :  { %v735_v47 = vadd.f32 %v734_v46, %v733_v45 }
 0x4f7   :  { %v737_v49 = vadd.f32 %v736_v48, %v735_v47 }
 0x4f9   :  { %v738_v50 = vrot.slane %v737_v49, 4 }
 0x4fb   :  { %v739_v51 = vadd.f32 %v738_v50, %v737_v49 }
 0x4fd   :  { %v740_v52 = vrot.slane %v739_v51, 2 }
 0x4ff   :  { %v741_v53 = vadd.f32 %v740_v52, %v739_v51 }
 0x501   :  { %v742_v54 = vrot.slane %v741_v53, 1 }
 0x503   :  { %v743_v55 = vadd.f32 %v742_v54, %v741_v53  ;;  %v1526_v53 = vld [vmem:[%s1934_s10] sm:$0xff]   ;;  %v1527_v54 = vld [vmem:[%s1934_s10 + $0x8] sm:$0xff]  }
 0x505   :  { %1438 = vmatmul.mubr.msk.f32.vlgmr.msra.gmra.mrb[14].mxu0 %vm81_vm0, %v743_v55 }
 0x506   :  { %1453 = vmatprep.mubr.msk.bf16.mxu0 %vm292_vm1, %v1643_v11 }
 0x5d8   :  { %v813_v56 = vpop.f32.mrb[14].mxu0 }
 0x5d9   :  { %v817_v57 = vmul.f32 0.0078125, %v813_v56  ;;  %v1439_v58 = vpop.f32.mrb[15].mxu0 }
 0x5db   :  { %v818_v59 = vadd.f32 1e-05, %v817_v57 }
 0x5dd   :  { %1529 = vrsqrt.f32 %v818_v59 }
 0x5e7   :  { %v1530_v60 = vpop.eup %1529 }
 0x5e8   :  { %1443 = vmatmul.mubr.msk.f32.vlgmr.msra.gmra.mrb[22].mxu1 %vm414_vm3, %v1530_v60 }
 0x5e9   :  { %1469 = vmatprep.mubr.msk.bf16.mxu1 %vm292_vm1, %v1643_v11 }
 0x6bb   :  { %v889_v61 = vpop.f32.mrb[22].mxu1 }
 0x6bc   :  { %v896_v62 = vrot.slane %v889_v61, %v705_v13  ;;  %v1444_v63 = vpop.f32.mrb[23].mxu1 }
 0x6be   :  { %v897_v1 = vmul.f32 %v896_v62, %v707_v19  ;;  %v898_v2 = vmul.f32 %v896_v62, %v708_v17  ;;  %v899_v3 = vmul.f32 %v896_v62, %v709_v21  ;;  %v900_v4 = vmul.f32 %v896_v62, %v710_v23 }
 0x6bf   :  { %v901_v6 = vmul.f32 %v896_v62, %v711_v15  ;;  %v902_v7 = vmul.f32 %v896_v62, %v712_v25  ;;  %v903_v8 = vmul.f32 %v896_v62, %v713_v30  ;;  %v904_v9 = vmul.f32 %v896_v62, %v714_v33 }
 0x6c0   :  { %v912_v11 = vmul.f32 %v1298_v0, %v897_v1  ;;  %v913_v10 = vmul.f32 %v1298_v0, %v898_v2  ;;  %v914_v13 = vmul.f32 %v1298_v0, %v899_v3  ;;  %v915_v14 = vmul.f32 %v1298_v0, %v900_v4 }
 0x6c1   :  { %v916_v16 = vmul.f32 %v1298_v0, %v901_v6  ;;  %v917_v18 = vmul.f32 %v1298_v0, %v902_v7  ;;  %v918_v22 = vmul.f32 %v1298_v0, %v903_v8  ;;  %v919_v24 = vmul.f32 %v1298_v0, %v904_v9 }
 0x6c2   :  { %v1784_v20 = vadd.f32 %v1299_v5, %v912_v11  ;;  %v1786_v19 = vadd.f32 %v1299_v5, %v913_v10  ;;  %v1788_v17 = vadd.f32 %v1299_v5, %v914_v13  ;;  %v1790_v21 = vadd.f32 %v1299_v5, %v915_v14 }
 0x6c3   :  { %v1792_v23 = vadd.f32 %v1299_v5, %v916_v16  ;;  %v1794_v15 = vadd.f32 %v1299_v5, %v917_v18  ;;  %v1806_v30 = vadd.f32 %v1299_v5, %v918_v22  ;;  %v1817_v33 = vadd.f32 %v1299_v5, %v919_v24 }
 0x6c4   :  { %v935_v25 = vmax.f32 %v1784_v20, 0.0  ;;  %v936_v26 = vmax.f32 %v1786_v19, 0.0  ;;  %v937_v28 = vmax.f32 %v1788_v17, 0.0  ;;  %v938_v27 = vmax.f32 %v1790_v21, 0.0 }
 0x6c5   :  { %v939_v32 = vmax.f32 %v1792_v23, 0.0  ;;  %v940_v34 = vmax.f32 %v1794_v15, 0.0  ;;  %v941_v36 = vmax.f32 %v1806_v30, 0.0  ;;  %v942_v39 = vmax.f32 %v1817_v33, 0.0  ;;  %v1308_v33 = vld [vmem:[%s1935_s11] ss:$0 sm:$0xff] }
 0x6c6   :  { %v1804_v29 = vpack.c.bf16 %v936_v26, %v935_v25  ;;  %v1813_v31 = vpack.c.bf16 %v938_v27, %v937_v28 }
 0x6c7   :  { %v1825_v35 = vpack.c.bf16 %v940_v34, %v939_v32  ;;  %v1835_v40 = vpack.c.bf16 %v942_v39, %v941_v36 }
 0x6c8   :  { %1445 = vmatprep.subr.bf16.mxu0 %v1804_v29 }
 0x6c9   :  { %1446 = vmatpush3.bf16.msra.mxu0 %v1804_v29 }
 0x6ca   :  { %1447 = vmatprep.subr.bf16.mxu0 %v1813_v31 }
 0x6cd   :  { %1448 = vmatpush3.bf16.msra.mxu0 %v1813_v31 }
 0x6ce   :  { %1449 = vmatprep.subr.bf16.mxu0 %v1825_v35 }
 0x6d1   :  { %1450 = vmatpush3.bf16.msra.mxu0 %v1825_v35 }
 0x6d2   :  { %1451 = vmatprep.subr.bf16.mxu0 %v1835_v40 }
 0x6d5   :  { %1452 = vmatpush3.bf16.msra.mxu0 %v1835_v40 }
 0x6d6   :  { %1477 = vmatprep.subr.bf16.mxu0 %v1526_v53 }
 0x6d8   :  { %1454 = vmatmul.mubr.msk.bf16.vlgmr.msra.gmra.mrb[16].mxu0 %vm292_vm1, %v1684_v37 }
 0x6d9   :  { %1457 = vmatprep.mubr.msk.bf16.mxu0 %vm292_vm1, %v1648_v12  ;;  %1478 = vmatpush3.bf16.msra.mxu0 %v1526_v53 }
 0x6da   :  { %1479 = vmatprep.subr.bf16.mxu0 %v1527_v54 }
 0x6dd   :  { %1480 = vmatpush3.bf16.msra.mxu0 %v1527_v54 }
 0x6e0   :  { %1458 = vmatmul.mubr.msk.bf16.gmra.mrb[20].mxu0 %vm292_vm1, %v1689_v38 }
 0x7ab   :  { %v1455_v41 = vpop.f32.mrb[16].mxu0 }
 0x7ac   :  { %v981_v42 = vpop.f32.mrb[17].mxu0 }
 0x7ad   :  { %v1456_v43 = vpop.f32.mrb[18].mxu0 }
 0x7ae   :  { %v1013_v44 = vpack.c.bf16 %v1456_v43, %v1455_v41  ;;  %v984_v45 = vpop.f32.mrb[19].mxu0 }
 0x7af   :  { %v1012_v46 = vpack.c.bf16 %v984_v45, %v981_v42 }
 0x7b0   :  { %1107 = vrot.lane.b32.xlu1 %v1013_v44, %s1532_s3 }
 0x7b1   :  { %1105 = vrot.lane.b32.xlu0 %v1012_v46, %s1532_s3  ;;  %1461 = vmatprep.subr.bf16.mxu1 %v1012_v46 }
 0x7b2   :  { %1462 = vmatpush3.bf16.msra.mxu1 %v1012_v46 }
 0x7b3   :  { %v1459_v47 = vpop.f32.mrb[20].mxu0  ;;  %1463 = vmatprep.subr.bf16.mxu1 %v1013_v44 }
 0x7b4   :  { %v997_v48 = vpop.f32.mrb[21].mxu0 }
 0x7b5   :  { %v1460_v49 = vpop.f32.mrb[22].mxu0 }
 0x7b6   :  { %v1015_v50 = vpack.c.bf16 %v1460_v49, %v1459_v47  ;;  %v1000_v51 = vpop.f32.mrb[23].mxu0  ;;  %1464 = vmatpush3.bf16.msra.mxu1 %v1013_v44 }
 0x7b7   :  { %v1014_v52 = vpack.c.bf16 %v1000_v51, %v997_v48 }
 0x7b9   :  { %1465 = vmatprep.subr.bf16.mxu1 %v1014_v52 }
 0x7ba   :  { %1466 = vmatpush3.bf16.msra.mxu1 %v1014_v52 }
 0x7bb   :  { %1467 = vmatprep.subr.bf16.mxu1 %v1015_v50 }
 0x7be   :  { %1468 = vmatpush3.bf16.msra.mxu1 %v1015_v50 }
 0x7c1   :  { %1470 = vmatmul.mubr.msk.bf16.vlgmr.msra.gmra.mrb[24].mxu1 %vm292_vm1, %v1684_v37  ;;  %v1528_v37 = vld [vmem:[%s1934_s10 + $0x10] sm:$0xff]   ;;  %s1536_s10 = smov 32  }
 0x7c2   :  { %1473 = vmatprep.mubr.msk.bf16.mxu1 %vm292_vm1, %v1648_v12  ;;  %1481 = vmatprep.subr.bf16.mxu0 %v1528_v37 }
 0x7c3   :  { %1482 = vmatpush3.bf16.msra.mxu0 %v1528_v37 }
 0x7c9   :  { %1474 = vmatmul.mubr.msk.bf16.gmra.mrb[28].mxu1 %vm292_vm1, %v1689_v38 }
 0x822   :  { %v1108_v19 = vpop.permute.xlu1 %1107 }
 0x823   :  { %v1106_v17 = vpop.permute.xlu0 %1105  ;;  %v1130_v23 = vsel %vm81_vm0, %v1813_v31, %v1108_v19 }
 0x824   :  { %v1127_v22 = vsel %vm81_vm0, %v1804_v29, %v1106_v17 }
 0x894   :  { %v1471_v12 = vpop.f32.mrb[24].mxu1 }
 0x895   :  { %v1083_v38 = vmul.f32 2.0, %v1471_v12  ;;  %v1050_v55 = vpop.f32.mrb[25].mxu1 }
 0x896   :  { %v1081_v56 = vmul.f32 2.0, %v1050_v55  ;;  %v1472_v57 = vpop.f32.mrb[26].mxu1 }
 0x897   :  { %v1084_v58 = vmul.f32 2.0, %v1472_v57  ;;  %v1053_v59 = vpop.f32.mrb[27].mxu1  ;;  %v1091_v61 = vsub.f32 %v1083_v38, %v937_v28 }
 0x898   :  { %v1082_v60 = vmul.f32 2.0, %v1053_v59  ;;  %v1089_v63 = vsub.f32 %v1081_v56, %v935_v25 }
 0x899   :  { %v1092_v62 = vsub.f32 %v1084_v58, %v938_v27 }
 0x89a   :  { %v1090_v0 = vsub.f32 %v1082_v60, %v936_v26 }
 0x89b   :  { %v1098_v1 = vpack.c.bf16 %v1092_v62, %v1091_v61 }
 0x89c   :  { %v1475_v2 = vpop.f32.mrb[28].mxu1  ;;  %v1097_v3 = vpack.c.bf16 %v1090_v0, %v1089_v63 }
 0x89d   :  { %v1087_v4 = vmul.f32 2.0, %v1475_v2  ;;  %1119 = vrot.lane.b32.xlu1 %v1098_v1, %s1536_s10  ;;  %v1066_v5 = vpop.f32.mrb[29].mxu1 }
 0x89e   :  { %v1085_v6 = vmul.f32 2.0, %v1066_v5  ;;  %1117 = vrot.lane.b32.xlu0 %v1097_v3, %s1536_s10  ;;  %v1476_v7 = vpop.f32.mrb[30].mxu1 }
 0x89f   :  { %v1088_v8 = vmul.f32 2.0, %v1476_v7  ;;  %v1069_v9 = vpop.f32.mrb[31].mxu1  ;;  %v1095_v10 = vsub.f32 %v1087_v4, %v941_v36 }
 0x8a0   :  { %v1086_v11 = vmul.f32 2.0, %v1069_v9  ;;  %v1093_v14 = vsub.f32 %v1085_v6, %v939_v32 }
 0x8a1   :  { %v1096_v13 = vsub.f32 %v1088_v8, %v942_v39  ;;  %1111 = vrot.lane.b32.xlu1 %v1015_v50, %s1532_s3 }
 0x8a2   :  { %v1094_v16 = vsub.f32 %v1086_v11, %v940_v34  ;;  %1109 = vrot.lane.b32.xlu0 %v1014_v52, %s1532_s3 }
 0x8a3   :  { %v1100_v18 = vpack.c.bf16 %v1096_v13, %v1095_v10 }
 0x8a4   :  { %v1099_v20 = vpack.c.bf16 %v1094_v16, %v1093_v14 }
 0x8a5   :  { %1123 = vrot.lane.b32.xlu1 %v1100_v18, %s1536_s10 }
 0x8a6   :  { %1121 = vrot.lane.b32.xlu0 %v1099_v20, %s1536_s10 }
 0x90f   :  { %v1120_v21 = vpop.permute.xlu1 %1119 }
 0x910   :  { %v1118_v24 = vpop.permute.xlu0 %1117  ;;  %v1141_v25 = vsel %vm1137_vm6, %v1130_v23, %v1120_v21 }
 0x911   :  { %v1139_v15 = vsel %vm1137_vm6, %v1127_v22, %v1118_v24 }
 0x912   :  { %1483 = vmatprep.mubr.msk.bf16.mxu0 %vm1177_vm7, %v1139_v15 }
 0x913   :  { %v1112_v26 = vpop.permute.xlu1 %1111  ;;  %1484 = vmatmul.mubr.msk.bf16.vlgmr.msra.gmra.mrb[24].mxu0 %vm1177_vm7, %v1141_v25 }
 0x914   :  { %v1110_v28 = vpop.permute.xlu0 %1109  ;;  %v1136_v29 = vsel %vm81_vm0, %v1835_v40, %v1112_v26 }
 0x915   :  { %v1133_v30 = vsel %vm81_vm0, %v1825_v35, %v1110_v28 }
 0x917   :  { %v1124_v27 = vpop.permute.xlu1 %1123 }
 0x918   :  { %v1122_v32 = vpop.permute.xlu0 %1121  ;;  %v1145_v34 = vsel %vm1137_vm6, %v1136_v29, %v1124_v27 }
 0x919   :  { %v1143_v31 = vsel %vm1137_vm6, %v1133_v30, %v1122_v32 }
 0x91a   :  { %1487 = vmatprep.mubr.msk.bf16.mxu0 %vm1177_vm7, %v1143_v31 }
 0x91b   :  { %1488 = vmatmul.mubr.msk.bf16.gmra.mrb[28].mxu0 %vm1177_vm7, %v1145_v34 }
 0x9e6   :  { %v1485_v36 = vpop.f32.mrb[24].mxu0 }
 0x9e7   :  { %v1229_v39 = vadd.f32 %v1485_v36, %v1308_v33  ;;  %v1220_v41 = vpop.f32.mrb[25].mxu0 }
 0x9e8   :  { %v1221_v35 = vadd.f32 %v1308_v33, %v1220_v41  ;;  %v1486_v42 = vpop.f32.mrb[26].mxu0 }
 0x9e9   :  { %1253 = vst [vmem:[%s1936_s12 + $0x10] sm:$0xff] %v1229_v39  ;;  %v1232_v40 = vadd.f32 %v1486_v42, %v1308_v33  ;;  %v1223_v43 = vpop.f32.mrb[27].mxu0 }
 0x9ea   :  { %1251 = vst [vmem:[%s1936_s12] sm:$0xff] %v1221_v35  ;;  %v1224_v44 = vadd.f32 %v1308_v33, %v1223_v43 }
 0x9eb   :  { %1254 = vst [vmem:[%s1936_s12 + $0x18] sm:$0xff] %v1232_v40 }
 0x9ec   :  { %1252 = vst [vmem:[%s1936_s12 + $0x8] sm:$0xff] %v1224_v44 }
 0x9ee   :  { %v1489_v45 = vpop.f32.mrb[28].mxu0 }
 0x9ef   :  { %v1245_v46 = vadd.f32 %v1489_v45, %v1308_v33  ;;  %v1236_v47 = vpop.f32.mrb[29].mxu0 }
 0x9f0   :  { %v1237_v48 = vadd.f32 %v1308_v33, %v1236_v47  ;;  %v1490_v49 = vpop.f32.mrb[30].mxu0 }
 0x9f1   :  { %1257 = vst [vmem:[%s1936_s12 + $0x30] sm:$0xff] %v1245_v46  ;;  %v1248_v50 = vadd.f32 %v1490_v49, %v1308_v33  ;;  %v1239_v51 = vpop.f32.mrb[31].mxu0 }
 0x9f2   :  { %1255 = vst [vmem:[%s1936_s12 + $0x20] sm:$0xff] %v1237_v48  ;;  %v1240_v52 = vadd.f32 %v1308_v33, %v1239_v51 }
 0x9f3   :  { %1258 = vst [vmem:[%s1936_s12 + $0x38] sm:$0xff] %v1248_v50 }
 0x9f4   :  { %1256 = vst [vmem:[%s1936_s12 + $0x28] sm:$0xff] %v1240_v52 }

</bundles_post_ra>
